<compile_context>
chip_gen: v7x
topology: tpu7x:2x2x1
jax: 0.10.0
libtpu: 0.0.40
codegen_flags: <defaults>
</compile_context>

<pallas_src>
import jax
import jax.numpy as jnp
from jax.experimental import pallas as pl
from jax.experimental.pallas import tpu as pltpu


# ----------------------------------------------------------------------------
# Kernels
# ----------------------------------------------------------------------------
def _rowsum_exp_kernel(x_ref, s_ref):
    """s[i, 0] = sum_k exp(x[i, k]) for the (TM, N) row tile."""
    e = jnp.exp(x_ref[...].astype(jnp.float32))          # (TM, N)  VPU/EUP
    s_ref[...] = jnp.sum(e, axis=1, keepdims=True)        # (TM, 1)  XLU reduce


def _normalize_kernel(x_ref, denom_ref, o_ref):
    """out[i, j] = exp(x[i, j]) * (1 / denom[0, j]) for the (TM, N) row tile."""
    e = jnp.exp(x_ref[...].astype(jnp.float32))           # (TM, N)  EUP
    inv = pl.reciprocal(denom_ref[...], approx=True)       # (1, N)   EUP (vrcp)
    # Sublane broadcast of the lane-resident (1, N) row is free on the VPU;
    # reciprocal-multiply replaces N^2 VPU divides.
    o_ref[...] = (e * inv).astype(o_ref.dtype)


# ----------------------------------------------------------------------------
# Wrapper
# ----------------------------------------------------------------------------
def _pick_tile_rows(n, itemsize=4, target_block_bytes=4 << 20):
    """Biggest multiple-of-8 row count so a (tm, n) f32 block stays ~<= 4 MiB.

    With input + output double-buffered that is <= ~16 MiB of pipeline buffers,
    comfortably inside the scoped-VMEM limit on v5e / v6e and v7x's smaller
    64 MiB physical VMEM.
    """
    tm = target_block_bytes // (itemsize * max(n, 1))
    tm = max(8, (tm // 8) * 8)
    return min(tm, n)


def softmax_pallas(x, tm=None):
    """x: (N, N) array. Returns exp(x) / sum(exp(x), dim=1) with PyTorch
    broadcasting semantics (denominator broadcast over the last axis)."""
    assert x.ndim == 2 and x.shape[0] == x.shape[1], (
        "module's (N,N)/(N,) broadcast requires a square 2-D input")
    n = x.shape[0]
    if tm is None:
        tm = _pick_tile_rows(n)
    tm = min(tm, n)
    grid = (pl.cdiv(n, tm),)

    cparams = pltpu.CompilerParams(
        dimension_semantics=("parallel",),          # shards row tiles across TCs (v7x)
        vmem_limit_bytes=32 * 1024 * 1024,
    )

    # --- Pass 1: global row sums of exp(x)  ->  (N, 1) -------------------
    rowsum = pl.pallas_call(
        _rowsum_exp_kernel,
        out_shape=jax.ShapeDtypeStruct((n, 1), jnp.float32),
        grid=grid,
        in_specs=[pl.BlockSpec((tm, n), lambda i: (i, 0))],
        out_specs=pl.BlockSpec((tm, 1), lambda i: (i, 0)),
        compiler_params=cparams,
        cost_estimate=pl.CostEstimate(
            flops=n * n, transcendentals=n * n,
            bytes_accessed=4 * n * n + 4 * n),
    )(x)

    # The denominator is indexed by OUTPUT COLUMN (PyTorch's last-axis
    # broadcast), so put it on the lane axis: (N, 1) -> (1, N).  Only N floats.
    denom = rowsum.reshape(1, n)

    # --- Pass 2: normalize each (TM, N) row tile --------------------------
    out = pl.pallas_call(
        _normalize_kernel,
        out_shape=jax.ShapeDtypeStruct((n, n), x.dtype),
        grid=grid,
        in_specs=[
            pl.BlockSpec((tm, n), lambda i: (i, 0)),   # x row tile
            pl.BlockSpec((1, n), lambda i: (0, 0)),    # shared denominator row
        ],
        out_specs=pl.BlockSpec((tm, n), lambda i: (i, 0)),
        compiler_params=cparams,
        cost_estimate=pl.CostEstimate(
            flops=2 * n * n, transcendentals=n * n + n,
            bytes_accessed=8 * n * n + 4 * n),
    )(x, denom)
    return out


def softmax_ref(x):
    # pure-JAX reference mirroring the PyTorch expression exactly
    e = jnp.exp(x)
    return e / jnp.sum(e, axis=1)   # (N,N) / (N,) -> broadcast on last axis


if __name__ == "__main__":
    key = jax.random.PRNGKey(0)
    # Square (batch, features) input required by the module's broadcast.
    # N=256 keeps the last dim lane-dense (multiple of 128); tm=64 gives a
    # 4-step row grid so the pipelined path is actually exercised.
    N = 256
    x = jax.random.normal(key, (N, N), dtype=jnp.float32)

    out = softmax_pallas(x, tm=64)
    out = jax.block_until_ready(out)

    ref = softmax_ref(x)
    assert out.shape == ref.shape and out.dtype == ref.dtype
    # approx reciprocal (EUP vrcp) carries ~1e-4 relative error; tolerance
    # reflects that while still catching any real normalization bug.
    assert jnp.allclose(out, ref, rtol=5e-3, atol=1e-6), (
        "mismatch vs reference: max abs err "
        f"{float(jnp.max(jnp.abs(out - ref)))}")

    print("KERNEL_OK")
</pallas_src>

<mosaic_0001>
module attributes {stable_mosaic.version = 11 : i64} {
  func.func @_rowsum_exp_kernel(%arg0: i32, %arg1: memref<64x256xf32, #tpu.memory_space<vmem>>, %arg2: memref<64x1xf32, #tpu.memory_space<vmem>>) attributes {dimension_semantics = [#tpu.dimension_semantics<parallel>], iteration_bounds = array<i64: 4>, scalar_prefetch = 0 : i64, scratch_operands = 0 : i64, tpu.core_type = #tpu.core_type<tc>, window_params = [{transform_indices = @transform_0, window_bounds = array<i64: 64, 256>}, {transform_indices = @transform_1, window_bounds = array<i64: 64, 1>}]} {
    %c0 = arith.constant 0 : index
    %c0_0 = arith.constant 0 : index
    %0 = vector.load %arg1[%c0, %c0_0] : memref<64x256xf32, #tpu.memory_space<vmem>>, vector<64x256xf32>
    %1 = math.exp %0 : vector<64x256xf32>
    %cst = arith.constant dense<0.000000e+00> : vector<64xf32>
    %2 = vector.multi_reduction <add>, %1, %cst [1] : vector<64x256xf32> to vector<64xf32>
    %3 = vector.shape_cast %2 : vector<64xf32> to vector<64x1xf32>
    %c0_1 = arith.constant 0 : index
    %c0_2 = arith.constant 0 : index
    %4 = vector.load %arg2[%c0_1, %c0_2] : memref<64x1xf32, #tpu.memory_space<vmem>>, vector<64x1xf32>
    tpu.vector_store %arg2[%c0_1, %c0_2], %3 {strides = array<i32>} : memref<64x1xf32, #tpu.memory_space<vmem>>, vector<64x1xf32>,
    return
  }
  func.func @transform_0(%arg0: i32) -> (i32, i32) {
    %c0_i32 = arith.constant 0 : i32
    %c0_i32_0 = arith.constant 0 : i32
    return %arg0, %c0_i32 : i32, i32
  }
  func.func @transform_1(%arg0: i32) -> (i32, i32) {
    %c0_i32 = arith.constant 0 : i32
    %c0_i32_0 = arith.constant 0 : i32
    return %arg0, %c0_i32 : i32, i32
  }
}

</mosaic_0001>

<bundles_post_ra>
// kernel: tpu_custom_call.1
= control target key start
LH: loop header
LB: loop body
LE: loop exit
PB: predicated region body
PF: predicated region fallthrough
CT: control target
= control target key end

     0   :  { %6 = vsyncpa [#allocation3], 0  ;;  %s589_s0 = inlined_call_operand.hbm [shape: f32[256,256], index: 0, kind: input, shape index: {}]   ;;  %s590_s1 = inlined_call_operand.vmem [shape: f32[256,1], index: 1, kind: output, shape index: {}]  }
   0x1   :  { %8 = vsyncpa [#allocation3 + $0x1], 0  ;;  %s456_s6 = smov 0   ;;  %s458_s7 = smov 0  }
   0x2   :  { %s460_s8 = smov 0   ;;  %s462_s9 = smov 0  }
   0x3 LB: > { %s288_s10 = sadd.s32 4294967295, %s441_s9   ;;  %s476_s11 = sadd.s32 1, %s441_s9   ;;  %s441_s9 = sphi %s462_s9, %s597_s9   ;;  %s437_s8 = sphi %s460_s8, %s596_s8   ;;  %s433_s7 = sphi %s458_s7, %s595_s7   ;;  %s429_s6 = sphi %s456_s6, %s594_s6  }
   0x4   : > { %s18_s12 = ssub.s32 %s441_s9, %s476_s11  ;;  %s21_s13 = sadd.s32 1, %s437_s8 }
   0x5   : > { %p19_p0 = scmp.eq.s32.totalorder %s18_s12, 0  ;;  %p28_p1 = scmp.ne.s32.totalorder %s437_s8, %s433_s7 }
   0x6   : > { %p29_p2 = scmp.eq.s32.totalorder %s441_s9, 0  ;;  %p34_p3 = scmp.ne.s32.totalorder %s433_s7, %s429_s6 }
   0x7   : > { %s486_s14 = scalar_select %p19_p0, %s437_s8, %s21_s13  }
   0x8   : > { %p30_p4 = por %p29_p2, %p28_p1  ;;  %p35_p5 = scmp.eq.s32.totalorder %s288_s10, 0 }
   0x9   : > { %p310_p6 = scmp.lt.s32.totalorder %s441_s9, 4  ;;  %s84_s16 = sand.u32 1, %s437_s8  }
   0xa   : > { %p491_p7 = por %p35_p5, %p34_p3  ;;  %s292_s17 = sshll.u32 %s84_s16, 7 }
   0xb   : > { %s303_s18 = sshll.u32 %s441_s9, 11  ;;  %s88_s22 = scalar_lea.vmem [#allocation2], %s292_s17 }
   0xc   : > { %s500_s21 = scalar_lea.hbm %s589_s0, %s303_s18  ;;  %s96_s23 = sshll.u32 %s88_s22, 4  ;;  %s502_s23 = int_to_ptr.vmem [resolvable:$true] %s96_s23 }
   0xd   : > { %p504_p8 = pnand %p310_p6, %p30_p4  ;;  %s509_s25 = scalar_lea.sflag [#allocation3], %s84_s16 }
   0xe   : > { %s377_s26 = scalar_lea.hbm %s500_s21, 2048  ;;  %s382_s29 = scalar_lea.hbm %s589_s0, 8192 }
   0xf   : > { %p378_p10 = scmp.ne.s32.totalorder %s500_s21, %s377_s26  ;;  %p379_p11 = pneg %p504_p8 }
  0x10   : > { %p383_p0 = scmp.lt.u32.totalorder %s500_s21, %s589_s0  ;;  %p384_p1 = scmp.lt.u32.totalorder %s382_s29, %s377_s26 }
  0x11   : > { %p380_p12 = pnand %p379_p11, %p378_p10  ;;  %p386_p3 = scmp.lt.u32.totalorder %s377_s26, %s500_s21 }
  0x12   : > { %p385_p2 = por %p384_p1, %p383_p0 }
  0x13   : > { %p381_p13 = pneg %p380_p12 }
  0x14   : > { %p387_p4 = por %p386_p3, %p385_p2 }
  0x16   : > { %p388_p5 = pnand %p387_p4, %p381_p13 }
  0x18   : > { %391 = shalt.err (!%p388_p5)
}
  0x19   : > { %s392_s3 = scalar_lea.vmem %s502_s23, 2048  ;;  %s443_s4 = smov [#allocation2]  }
  0x1a   : > { %p393_p6 = scmp.ne.s32.totalorder %s502_s23, %s392_s3  ;;  %s397_s5 = sshll.u32 %s443_s4, 4  ;;  %s398_s5 = int_to_ptr.vmem [resolvable:$false] %s397_s5 }
  0x1b   : > { %s399_s6 = scalar_lea.vmem %s398_s5, 4096  ;;  %p400_p9 = scmp.lt.s32.totalorder %s502_s23, %s398_s5 }
  0x1c   : > { %p395_p10 = pnand %p393_p6, %p379_p11  ;;  %p401_p0 = scmp.lt.s32.totalorder %s399_s6, %s392_s3 }
  0x1e   : > { %p396_p12 = pneg %p395_p10  ;;  %p402_p1 = por %p401_p0, %p400_p9 }
  0x20   : > { %p403_p2 = pnand %p402_p1, %p396_p12 }
  0x22   : > { %406 = shalt.err (!%p403_p2)
}
  0x23   : > { %s444_s12 = smov 256   ;;  %s445_s13 = smov 16  }
  0x24   : > { %309 = dma.hbm_to_vmem [thread:$0]  (!%p504_p8), %s500_s21, 2048, %s502_s23, %s509_s25, %s444_s12, %s444_s12, %s445_s13  }
  0x25   : > { %p104_p11 = scmp.lt.s32.totalorder %s441_s9, 5  ;;  %p593_p13 = scmp.ge.s32.totalorder %s441_s9, 1 }
  0x27   : > { %p105_p3 = pnand %p593_p13, %p104_p11 }
  0x28   : > { %s110_s16 = sand.u32 (!%p105_p3), 1, %s433_s7  }
  0x29   : > { %108 = sbr.rel (%p105_p3) target bundleno = 223 (0xdf), region = 24  ;;  %s297_s17 = sshll.u32 (!%p105_p3), %s110_s16, 7 }
  0x2a   : > { %s111_s18 = scalar_lea.sflag (!%p105_p3), [#allocation3], %s110_s16  ;;  %s541_s19 = scalar_lea.vmem (!%p105_p3), [#allocation2], %s297_s17 }
  0x30   : > { %424 = dma.done.wait (%p491_p7), %s111_s18, 2048  }
  0x31   : > { %426 = vsyncadd (%p491_p7), %s111_s18, 4294965248  ;;  %v144_v0 = vld [vmem:[%s541_s19 + $0x20] sm:$0xff]  ;;  %v145_v1 = vld [vmem:[%s541_s19 + $0x28] sm:$0xff]  ;;  %s298_s15 = sshll.u32 %s288_s10, 3  ;;  %vm212_vm0 = vcmask 7168  }
  0x32   : > { %v140_v2 = vld [vmem:[%s541_s19] sm:$0xff]  ;;  %v164_v3 = vmul.f32 1.442695, %v144_v0  ;;  %v166_v4 = vmul.f32 1.442695, %v145_v1  ;;  %v141_v5 = vld [vmem:[%s541_s19 + $0x8] sm:$0xff] }
  0x33   : > { %v146_v6 = vld [vmem:[%s541_s19 + $0x30] sm:$0xff]  ;;  %v156_v7 = vmul.f32 1.442695, %v140_v2  ;;  %v158_v8 = vmul.f32 1.442695, %v141_v5  ;;  %v147_v9 = vld [vmem:[%s541_s19 + $0x38] sm:$0xff] }
  0x34   : > { %v142_v10 = vld [vmem:[%s541_s19 + $0x10] sm:$0xff]  ;;  %345 = vpow2.f32 %v164_v3  ;;  %v168_v11 = vmul.f32 1.442695, %v146_v6  ;;  %v143_v12 = vld [vmem:[%s541_s19 + $0x18] sm:$0xff]  ;;  %v170_v13 = vmul.f32 1.442695, %v147_v9 }
  0x35   : > { %347 = vpow2.f32 %v166_v4  ;;  %v150_v14 = vld [vmem:[%s541_s19 + $0x50] sm:$0xff]  ;;  %v160_v15 = vmul.f32 1.442695, %v142_v10  ;;  %v151_v16 = vld [vmem:[%s541_s19 + $0x58] sm:$0xff]  ;;  %v162_v17 = vmul.f32 1.442695, %v143_v12 }
  0x36   : > { %349 = vpow2.f32 %v156_v7  ;;  %v148_v18 = vld [vmem:[%s541_s19 + $0x40] sm:$0xff]  ;;  %v176_v19 = vmul.f32 1.442695, %v150_v14  ;;  %v149_v20 = vld [vmem:[%s541_s19 + $0x48] sm:$0xff]  ;;  %v178_v21 = vmul.f32 1.442695, %v151_v16 }
  0x37   : > { %351 = vpow2.f32 %v158_v8  ;;  %v154_v22 = vld [vmem:[%s541_s19 + $0x70] sm:$0xff]  ;;  %v172_v23 = vmul.f32 1.442695, %v148_v18  ;;  %v155_v24 = vld [vmem:[%s541_s19 + $0x78] sm:$0xff]  ;;  %v174_v25 = vmul.f32 1.442695, %v149_v20 }
  0x38   : > { %353 = vpow2.f32 %v168_v11  ;;  %v152_v26 = vld [vmem:[%s541_s19 + $0x60] sm:$0xff]  ;;  %v184_v27 = vmul.f32 1.442695, %v154_v22  ;;  %v153_v28 = vld [vmem:[%s541_s19 + $0x68] sm:$0xff]  ;;  %v186_v29 = vmul.f32 1.442695, %v155_v24 }
  0x39   : > { %355 = vpow2.f32 %v170_v13  ;;  %v180_v31 = vmul.f32 1.442695, %v152_v26  ;;  %v182_v33 = vmul.f32 1.442695, %v153_v28  ;;  %p135_p7 = scmp.lt.s32.totalorder %s298_s15, 31 }
  0x3a   : > { %357 = vpow2.f32 %v160_v15 }
  0x3b   : > { %359 = vpow2.f32 %v162_v17  ;;  %s599_s15 = smov (!%p135_p7, %s298_s15), 31 }
  0x3c   : > { %361 = vpow2.f32 %v176_v19  ;;  %s299_s20 = sshll.u32 %s599_s15, 3 }
  0x3d   : > { %363 = vpow2.f32 %v178_v21  ;;  %s138_s23 = scalar_lea.vmem %s590_s1, %s299_s20 }
  0x3e   : > { %v346_v30 = vpop.eup %345  ;;  %365 = vpow2.f32 %v172_v23 }
  0x3f   : > { %v348_v32 = vpop.eup %347  ;;  %367 = vpow2.f32 %v174_v25 }
  0x40   : > { %v350_v34 = vpop.eup %349  ;;  %v194_v35 = vadd.f32 %v348_v32, %v346_v30  ;;  %369 = vpow2.f32 %v184_v27 }
  0x41   : > { %v352_v36 = vpop.eup %351  ;;  %371 = vpow2.f32 %v186_v29 }
  0x42   : > { %v354_v37 = vpop.eup %353  ;;  %195 = vadd.xlane.f32.xlu1 %v194_v35  ;;  %v188_v38 = vadd.f32 %v352_v36, %v350_v34  ;;  %373 = vpow2.f32 %v180_v31 }
  0x43   : > { %v356_v39 = vpop.eup %355  ;;  %375 = vpow2.f32 %v182_v33 }
  0x44   : > { %v358_v40 = vpop.eup %357  ;;  %189 = vadd.xlane.f32.xlu0 %v188_v38  ;;  %v197_v41 = vadd.f32 %v356_v39, %v354_v37 }
  0x45   : > { %v360_v42 = vpop.eup %359 }
  0x46   : > { %v362_v43 = vpop.eup %361  ;;  %198 = vadd.xlane.f32.xlu1 %v197_v41  ;;  %v191_v44 = vadd.f32 %v360_v42, %v358_v40 }
  0x47   : > { %v364_v45 = vpop.eup %363 }
  0x48   : > { %v366_v46 = vpop.eup %365  ;;  %192 = vadd.xlane.f32.xlu0 %v191_v44  ;;  %v203_v47 = vadd.f32 %v364_v45, %v362_v43 }
  0x49   : > { %v368_v48 = vpop.eup %367 }
  0x4a   : > { %v370_v49 = vpop.eup %369  ;;  %204 = vadd.xlane.f32.xlu1 %v203_v47  ;;  %v200_v50 = vadd.f32 %v368_v48, %v366_v46 }
  0x4b   : > { %v372_v51 = vpop.eup %371 }
  0x4c   : > { %v374_v52 = vpop.eup %373  ;;  %201 = vadd.xlane.f32.xlu0 %v200_v50  ;;  %v209_v53 = vadd.f32 %v372_v51, %v370_v49 }
  0x4d   : > { %v376_v54 = vpop.eup %375 }
  0x4e   : > { %210 = vadd.xlane.f32.xlu1 %v209_v53  ;;  %v206_v55 = vadd.f32 %v376_v54, %v374_v52 }
  0x50   : > { %207 = vadd.xlane.f32.xlu0 %v206_v55 }
  0xcf   : > { %v196_v56 = vpop.xlane.xlu1 %195 }
  0xd0   : > { %215 = vst.msk [vmem:[%s138_s23 + $0x10] sm:$0xff] %vm212_vm0, %v196_v56 }
  0xd1   : > { %v190_v57 = vpop.xlane.xlu0 %189 }
  0xd2   : > { %213 = vst.msk [vmem:[%s138_s23] sm:$0xff] %vm212_vm0, %v190_v57 }
  0xd3   : > { %v199_v58 = vpop.xlane.xlu1 %198 }
  0xd4   : > { %216 = vst.msk [vmem:[%s138_s23 + $0x18] sm:$0xff] %vm212_vm0, %v199_v58 }
  0xd5   : > { %v193_v59 = vpop.xlane.xlu0 %192 }
  0xd6   : > { %214 = vst.msk [vmem:[%s138_s23 + $0x8] sm:$0xff] %vm212_vm0, %v193_v59 }
  0xd7   : > { %v205_v60 = vpop.xlane.xlu1 %204 }
  0xd8   : > { %218 = vst.msk [vmem:[%s138_s23 + $0x28] sm:$0xff] %vm212_vm0, %v205_v60 }
  0xd9   : > { %v202_v61 = vpop.xlane.xlu0 %201 }
  0xda   : > { %217 = vst.msk [vmem:[%s138_s23 + $0x20] sm:$0xff] %vm212_vm0, %v202_v61 }
  0xdb   : > { %v211_v62 = vpop.xlane.xlu1 %210 }
  0xdc   : > { %220 = vst.msk [vmem:[%s138_s23 + $0x38] sm:$0xff] %vm212_vm0, %v211_v62 }
  0xdd   : > { %v208_v63 = vpop.xlane.xlu0 %207 }
  0xde   : > { %219 = vst.msk [vmem:[%s138_s23 + $0x30] sm:$0xff] %vm212_vm0, %v208_v63 }
  0xdf PF: > { %p11_p8 = scmp.ge.s32.totalorder %s476_s11, 6   ;;  %s594_s6 = smov %s433_s7 }
  0xe0   : > { %s595_s7 = smov %s437_s8  ;;  %s596_s8 = smov %s486_s14 }
  0xe1   : > { %s597_s9 = smov %s476_s11  ;;  %13 = sbr.rel (!%p11_p8) target bundleno = 3 (0x3), region = 64 }
  0xe8   :  { %243 = vsyncpa [#allocation3], 1 }
  0xe9   :  { %245 = vsyncpa [#allocation3 + $0x1], 1 }

</bundles_post_ra>
